<compile_context>
chip_gen: v6e
topology: v6e:2x2x1
jax: 0.10.0
libtpu: 0.0.40
codegen_flags: <defaults>
</compile_context>

<pallas_src>
import jax
import jax.numpy as jnp
from jax.experimental import pallas as pl
from jax.experimental.pallas import tpu as pltpu


# ---------------------------------------------------------------------------
# Model dimensions (small, consistent with the module's constructor).
# ---------------------------------------------------------------------------
BATCH = 8
INPUT_DIM = 16          # input_shape  = (16,)
LATENT_DIM = 4          # latent_shape = (4,)
HIDDEN = 32             # hidden_dims  = (32, 32) for both encoder and decoder
LANES = 128             # TPU lane width; column count of the packed param slab


def _rup8(n):
    return ((n + 7) // 8) * 8


def _build_layout():
    """Row layout of the packed (SLAB_ROWS, 128) parameter slab.

    Each weight matrix occupies a contiguous, sublane-aligned (multiple-of-8)
    row block with its columns in lanes [0, d_out).  The 7 bias rows share a
    single trailing 8-row block.
    """
    specs = [
        ("we1", INPUT_DIM, HIDDEN),       # encoder layer 1 weight  (16, 32)
        ("we2", HIDDEN, HIDDEN),          # encoder layer 2 weight  (32, 32)
        ("wmu", HIDDEN, LATENT_DIM),      # encoder mu head         (32, 4)
        ("wls", HIDDEN, LATENT_DIM),      # encoder log-sigma head  (32, 4)
        ("wd1", LATENT_DIM, HIDDEN),      # decoder layer 1 weight  (4, 32)
        ("wd2", HIDDEN, HIDDEN),          # decoder layer 2 weight  (32, 32)
        ("wd3", HIDDEN, INPUT_DIM),       # decoder layer 3 weight  (32, 16)
        ("bias", 7, LANES),               # bias rows: be1,be2,bmu,bls,bd1,bd2,bd3
    ]
    layout, off = {}, 0
    for name, rows, cols in specs:
        layout[name] = (off, rows, cols)
        off += _rup8(rows)
    return layout, off


_LAYOUT, SLAB_ROWS = _build_layout()
_BIAS_OFF = _LAYOUT["bias"][0]
# (row index within bias block, bias width)
_BIAS_ROWS = {
    "be1": (0, HIDDEN), "be2": (1, HIDDEN),
    "bmu": (2, LATENT_DIM), "bls": (3, LATENT_DIM),
    "bd1": (4, HIDDEN), "bd2": (5, HIDDEN), "bd3": (6, INPUT_DIM),
}


# ---------------------------------------------------------------------------
# Kernel
# ---------------------------------------------------------------------------
def _vae_kernel(x_ref, eps_ref, w_ref, recon_ref, kl_ref):
    """Fused VAE forward: encoder MLP -> reparameterize -> KL -> decoder MLP."""

    def weight(name):
        off, r, c = _LAYOUT[name]
        return w_ref[off:off + r, 0:c]            # static, sublane-aligned view

    # Load the (8, 128) bias block once; slice rows from the loaded value.
    bias_blk = w_ref[_BIAS_OFF:_BIAS_OFF + 8, :]

    def bias(name):
        row, c = _BIAS_ROWS[name]
        return bias_blk[row:row + 1, 0:c]         # (1, c), broadcasts over batch

    x = x_ref[...]

    # ---- encoder: Linear -> ReLU -> Linear -> ReLU -> (mu | log-sigma) ------
    h = jnp.dot(x, weight("we1"), preferred_element_type=jnp.float32) + bias("be1")
    h = jnp.maximum(h, 0.0)
    h = jnp.dot(h, weight("we2"), preferred_element_type=jnp.float32) + bias("be2")
    h = jnp.maximum(h, 0.0)
    mu = jnp.dot(h, weight("wmu"), preferred_element_type=jnp.float32) + bias("bmu")
    logsig = jnp.dot(h, weight("wls"), preferred_element_type=jnp.float32) + bias("bls")

    # ---- reparameterization (eps supplied from outside) ----------------------
    sig = jnp.exp(logsig)                          # EUP slot, overlaps with VPU
    z = mu + sig * eps_ref[...]

    # ---- KL term: (sig**2 + mu**2 - log(sig) - 1/2).sum() --------------------
    # log(sig) == logsig (pre-activation): no exp->log round trip.
    kl_ref[0, 0] = jnp.sum(sig * sig + mu * mu - logsig - 0.5)

    # ---- decoder: Linear -> ReLU -> Linear -> ReLU -> Linear -----------------
    d = jnp.dot(z, weight("wd1"), preferred_element_type=jnp.float32) + bias("bd1")
    d = jnp.maximum(d, 0.0)
    d = jnp.dot(d, weight("wd2"), preferred_element_type=jnp.float32) + bias("bd2")
    d = jnp.maximum(d, 0.0)
    recon = jnp.dot(d, weight("wd3"), preferred_element_type=jnp.float32) + bias("bd3")
    recon_ref[...] = recon.astype(recon_ref.dtype)


# ---------------------------------------------------------------------------
# Host-side helpers
# ---------------------------------------------------------------------------
def pack_params(params):
    """Pack all weights/biases into one lane-padded (SLAB_ROWS, 128) f32 slab.

    The torch encoder output layer is a single (HIDDEN, 2*LATENT) Linear; it is
    split at pack time into lane-aligned mu / log-sigma heads (mathematically
    identical to slicing z afterwards).
    """
    slab = jnp.zeros((SLAB_ROWS, LANES), jnp.float32)
    mats = {
        "we1": params["we1"], "we2": params["we2"],
        "wmu": params["we3"][:, :LATENT_DIM], "wls": params["we3"][:, LATENT_DIM:],
        "wd1": params["wd1"], "wd2": params["wd2"], "wd3": params["wd3"],
    }
    for name, m in mats.items():
        off, r, c = _LAYOUT[name]
        slab = slab.at[off:off + r, 0:c].set(m.astype(jnp.float32))

    biases = {
        "be1": params["be1"], "be2": params["be2"],
        "bmu": params["be3"][:, :LATENT_DIM], "bls": params["be3"][:, LATENT_DIM:],
        "bd1": params["bd1"], "bd2": params["bd2"], "bd3": params["bd3"],
    }
    for name, b in biases.items():
        row, c = _BIAS_ROWS[name]
        slab = slab.at[_BIAS_OFF + row:_BIAS_OFF + row + 1, 0:c].set(
            b.astype(jnp.float32))
    return slab


@jax.jit
def vae_forward(x, eps, slab):
    """Fused VAE forward. Returns (reconstruction, kl) like the torch module
    (which stores kl in self.kl and returns the reconstruction)."""
    vmem = pl.BlockSpec(memory_space=pltpu.MemorySpace.VMEM)
    smem = pl.BlockSpec(memory_space=pltpu.MemorySpace.SMEM)
    recon, kl = pl.pallas_call(
        _vae_kernel,
        out_shape=(
            jax.ShapeDtypeStruct((x.shape[0], INPUT_DIM), jnp.float32),
            jax.ShapeDtypeStruct((1, 1), jnp.float32),
        ),
        in_specs=[vmem, vmem, vmem],
        out_specs=(vmem, smem),
    )(x, eps, slab)
    return recon, kl[0, 0]


def init_params(key):
    """Deterministic init matching nn.Linear shapes (stored (in, out))."""
    dims_enc = (INPUT_DIM, HIDDEN, HIDDEN, 2 * LATENT_DIM)
    dims_dec = (LATENT_DIM, HIDDEN, HIDDEN, INPUT_DIM)
    params = {}
    keys = jax.random.split(key, 12)
    ki = 0

    def linear(kw, kb, d_in, d_out):
        bound = 1.0 / jnp.sqrt(jnp.float32(d_in))
        w = jax.random.uniform(kw, (d_in, d_out), jnp.float32, -bound, bound)
        b = jax.random.uniform(kb, (1, d_out), jnp.float32, -bound, bound)
        return w, b

    for i in range(3):
        w, b = linear(keys[ki], keys[ki + 1], dims_enc[i], dims_enc[i + 1])
        params[f"we{i+1}"], params[f"be{i+1}"] = w, b
        ki += 2
    for i in range(3):
        w, b = linear(keys[ki], keys[ki + 1], dims_dec[i], dims_dec[i + 1])
        params[f"wd{i+1}"], params[f"bd{i+1}"] = w, b
        ki += 2
    return params


def vae_reference(x, eps, params):
    """Pure-JAX reference mirroring the PyTorch forward pass."""
    h = jnp.maximum(x @ params["we1"] + params["be1"], 0.0)
    h = jnp.maximum(h @ params["we2"] + params["be2"], 0.0)
    z = h @ params["we3"] + params["be3"]
    mu, logsig = z[:, :LATENT_DIM], z[:, LATENT_DIM:]
    sig = jnp.exp(logsig)
    zs = mu + sig * eps
    kl = jnp.sum(sig ** 2 + mu ** 2 - logsig - 0.5)
    d = jnp.maximum(zs @ params["wd1"] + params["bd1"], 0.0)
    d = jnp.maximum(d @ params["wd2"] + params["bd2"], 0.0)
    return d @ params["wd3"] + params["bd3"], kl


if __name__ == "__main__":
    key = jax.random.PRNGKey(0)
    k_x, k_eps, k_p = jax.random.split(key, 3)

    x = jax.random.normal(k_x, (BATCH, INPUT_DIM), jnp.float32)
    # Noise corresponding to self.N.sample(mu.shape) in the torch module.
    eps = jax.random.normal(k_eps, (BATCH, LATENT_DIM), jnp.float32)
    params = init_params(k_p)
    slab = pack_params(params)

    recon, kl = vae_forward(x, eps, slab)
    jax.block_until_ready((recon, kl))

    recon_exp, kl_exp = vae_reference(x, eps, params)
    assert recon.shape == (BATCH, INPUT_DIM) and recon.dtype == jnp.float32
    assert bool(jnp.isfinite(kl))
    assert bool(jnp.allclose(recon, recon_exp, rtol=1e-4, atol=1e-4))
    assert bool(jnp.allclose(kl, kl_exp, rtol=1e-4, atol=1e-4))
    print("KERNEL_OK")
</pallas_src>

<mosaic_0001>
module attributes {stable_mosaic.version = 11 : i64} {
  func.func @_vae_kernel(%arg0: memref<8x16xf32, #tpu.memory_space<vmem>>, %arg1: memref<8x4xf32, #tpu.memory_space<vmem>>, %arg2: memref<192x128xf32, #tpu.memory_space<vmem>>, %arg3: memref<8x16xf32, #tpu.memory_space<vmem>>, %arg4: memref<1x1xf32, #tpu.memory_space<smem>>) attributes {dimension_semantics = [], scalar_prefetch = 0 : i64, scratch_operands = 0 : i64, tpu.core_type = #tpu.core_type<tc>} {
    %c184 = arith.constant 184 : index
    %c0 = arith.constant 0 : index
    %0 = vector.load %arg2[%c184, %c0] : memref<192x128xf32, #tpu.memory_space<vmem>>, vector<8x128xf32>
    %c0_0 = arith.constant 0 : index
    %c0_1 = arith.constant 0 : index
    %1 = vector.load %arg0[%c0_0, %c0_1] : memref<8x16xf32, #tpu.memory_space<vmem>>, vector<8x16xf32>
    %c0_2 = arith.constant 0 : index
    %c0_3 = arith.constant 0 : index
    %2 = vector.load %arg2[%c0_2, %c0_3] : memref<192x128xf32, #tpu.memory_space<vmem>>, vector<16x32xf32>
    %cst = arith.constant dense<0.000000e+00> : vector<8x32xf32>
    %3 = tpu.matmul %1, %2, %cst {dimension_numbers = #tpu.dot_dimension_numbers<[1], [0], [0], [1], [0, 0, 1, 1], [], []>} : vector<8x16xf32>, vector<16x32xf32>, vector<8x32xf32> -> vector<8x32xf32>
    %4 = vector.extract_strided_slice %0 {offsets = [0, 0], sizes = [1, 32], strides = [1, 1]} : vector<8x128xf32> to vector<1x32xf32>
    %5 = vector.broadcast %4 : vector<1x32xf32> to vector<8x32xf32>
    %6 = arith.addf %3, %5 : vector<8x32xf32>
    %cst_4 = arith.constant 0.000000e+00 : f32
    %7 = vector.broadcast %cst_4 : f32 to vector<8x32xf32>
    %8 = arith.maximumf %6, %7 : vector<8x32xf32>
    %c16 = arith.constant 16 : index
    %c0_5 = arith.constant 0 : index
    %9 = vector.load %arg2[%c16, %c0_5] : memref<192x128xf32, #tpu.memory_space<vmem>>, vector<32x32xf32>
    %cst_6 = arith.constant dense<0.000000e+00> : vector<8x32xf32>
    %10 = tpu.matmul %8, %9, %cst_6 {dimension_numbers = #tpu.dot_dimension_numbers<[1], [0], [0], [1], [0, 0, 1, 1], [], []>} : vector<8x32xf32>, vector<32x32xf32>, vector<8x32xf32> -> vector<8x32xf32>
    %11 = vector.extract_strided_slice %0 {offsets = [1, 0], sizes = [1, 32], strides = [1, 1]} : vector<8x128xf32> to vector<1x32xf32>
    %12 = vector.broadcast %11 : vector<1x32xf32> to vector<8x32xf32>
    %13 = arith.addf %10, %12 : vector<8x32xf32>
    %cst_7 = arith.constant 0.000000e+00 : f32
    %14 = vector.broadcast %cst_7 : f32 to vector<8x32xf32>
    %15 = arith.maximumf %13, %14 : vector<8x32xf32>
    %c48 = arith.constant 48 : index
    %c0_8 = arith.constant 0 : index
    %16 = vector.load %arg2[%c48, %c0_8] : memref<192x128xf32, #tpu.memory_space<vmem>>, vector<32x4xf32>
    %cst_9 = arith.constant dense<0.000000e+00> : vector<8x4xf32>
    %17 = tpu.matmul %15, %16, %cst_9 {dimension_numbers = #tpu.dot_dimension_numbers<[1], [0], [0], [1], [0, 0, 1, 1], [], []>} : vector<8x32xf32>, vector<32x4xf32>, vector<8x4xf32> -> vector<8x4xf32>
    %18 = vector.extract_strided_slice %0 {offsets = [2, 0], sizes = [1, 4], strides = [1, 1]} : vector<8x128xf32> to vector<1x4xf32>
    %19 = vector.broadcast %18 : vector<1x4xf32> to vector<8x4xf32>
    %20 = arith.addf %17, %19 : vector<8x4xf32>
    %c80 = arith.constant 80 : index
    %c0_10 = arith.constant 0 : index
    %21 = vector.load %arg2[%c80, %c0_10] : memref<192x128xf32, #tpu.memory_space<vmem>>, vector<32x4xf32>
    %cst_11 = arith.constant dense<0.000000e+00> : vector<8x4xf32>
    %22 = tpu.matmul %15, %21, %cst_11 {dimension_numbers = #tpu.dot_dimension_numbers<[1], [0], [0], [1], [0, 0, 1, 1], [], []>} : vector<8x32xf32>, vector<32x4xf32>, vector<8x4xf32> -> vector<8x4xf32>
    %23 = vector.extract_strided_slice %0 {offsets = [3, 0], sizes = [1, 4], strides = [1, 1]} : vector<8x128xf32> to vector<1x4xf32>
    %24 = vector.broadcast %23 : vector<1x4xf32> to vector<8x4xf32>
    %25 = arith.addf %22, %24 : vector<8x4xf32>
    %26 = math.exp %25 : vector<8x4xf32>
    %c0_12 = arith.constant 0 : index
    %c0_13 = arith.constant 0 : index
    %27 = vector.load %arg1[%c0_12, %c0_13] : memref<8x4xf32, #tpu.memory_space<vmem>>, vector<8x4xf32>
    %28 = arith.mulf %26, %27 : vector<8x4xf32>
    %29 = arith.addf %20, %28 : vector<8x4xf32>
    %30 = arith.mulf %26, %26 : vector<8x4xf32>
    %31 = arith.mulf %20, %20 : vector<8x4xf32>
    %32 = arith.addf %30, %31 : vector<8x4xf32>
    %33 = arith.subf %32, %25 : vector<8x4xf32>
    %cst_14 = arith.constant 5.000000e-01 : f32
    %34 = vector.broadcast %cst_14 : f32 to vector<8x4xf32>
    %35 = arith.subf %33, %34 : vector<8x4xf32>
    %36 = vector.shape_cast %35 : vector<8x4xf32> to vector<1x8x4xf32>
    %cst_15 = arith.constant dense<0.000000e+00> : vector<1xf32>
    %37 = vector.multi_reduction <add>, %36, %cst_15 [1, 2] : vector<1x8x4xf32> to vector<1xf32>
    %38 = vector.shape_cast %37 : vector<1xf32> to vector<1x1x1xf32>
    %39 = vector.extract %38[0, 0, 0] : f32 from vector<1x1x1xf32>
    %c0_16 = arith.constant 0 : index
    %c0_17 = arith.constant 0 : index
    %40 = memref.load %arg4[%c0_16, %c0_17] : memref<1x1xf32, #tpu.memory_space<smem>>
    memref.store %39, %arg4[%c0_16, %c0_17] : memref<1x1xf32, #tpu.memory_space<smem>>
    %c112 = arith.constant 112 : index
    %c0_18 = arith.constant 0 : index
    %41 = vector.load %arg2[%c112, %c0_18] : memref<192x128xf32, #tpu.memory_space<vmem>>, vector<4x32xf32>
    %cst_19 = arith.constant dense<0.000000e+00> : vector<8x32xf32>
    %42 = tpu.matmul %29, %41, %cst_19 {dimension_numbers = #tpu.dot_dimension_numbers<[1], [0], [0], [1], [0, 0, 1, 1], [], []>} : vector<8x4xf32>, vector<4x32xf32>, vector<8x32xf32> -> vector<8x32xf32>
    %43 = vector.extract_strided_slice %0 {offsets = [4, 0], sizes = [1, 32], strides = [1, 1]} : vector<8x128xf32> to vector<1x32xf32>
    %44 = vector.broadcast %43 : vector<1x32xf32> to vector<8x32xf32>
    %45 = arith.addf %42, %44 : vector<8x32xf32>
    %cst_20 = arith.constant 0.000000e+00 : f32
    %46 = vector.broadcast %cst_20 : f32 to vector<8x32xf32>
    %47 = arith.maximumf %45, %46 : vector<8x32xf32>
    %c120 = arith.constant 120 : index
    %c0_21 = arith.constant 0 : index
    %48 = vector.load %arg2[%c120, %c0_21] : memref<192x128xf32, #tpu.memory_space<vmem>>, vector<32x32xf32>
    %cst_22 = arith.constant dense<0.000000e+00> : vector<8x32xf32>
    %49 = tpu.matmul %47, %48, %cst_22 {dimension_numbers = #tpu.dot_dimension_numbers<[1], [0], [0], [1], [0, 0, 1, 1], [], []>} : vector<8x32xf32>, vector<32x32xf32>, vector<8x32xf32> -> vector<8x32xf32>
    %50 = vector.extract_strided_slice %0 {offsets = [5, 0], sizes = [1, 32], strides = [1, 1]} : vector<8x128xf32> to vector<1x32xf32>
    %51 = vector.broadcast %50 : vector<1x32xf32> to vector<8x32xf32>
    %52 = arith.addf %49, %51 : vector<8x32xf32>
    %cst_23 = arith.constant 0.000000e+00 : f32
    %53 = vector.broadcast %cst_23 : f32 to vector<8x32xf32>
    %54 = arith.maximumf %52, %53 : vector<8x32xf32>
    %c152 = arith.constant 152 : index
    %c0_24 = arith.constant 0 : index
    %55 = vector.load %arg2[%c152, %c0_24] : memref<192x128xf32, #tpu.memory_space<vmem>>, vector<32x16xf32>
    %cst_25 = arith.constant dense<0.000000e+00> : vector<8x16xf32>
    %56 = tpu.matmul %54, %55, %cst_25 {dimension_numbers = #tpu.dot_dimension_numbers<[1], [0], [0], [1], [0, 0, 1, 1], [], []>} : vector<8x32xf32>, vector<32x16xf32>, vector<8x16xf32> -> vector<8x16xf32>
    %57 = vector.extract_strided_slice %0 {offsets = [6, 0], sizes = [1, 16], strides = [1, 1]} : vector<8x128xf32> to vector<1x16xf32>
    %58 = vector.broadcast %57 : vector<1x16xf32> to vector<8x16xf32>
    %59 = arith.addf %56, %58 : vector<8x16xf32>
    %c0_26 = arith.constant 0 : index
    %c0_27 = arith.constant 0 : index
    %60 = vector.load %arg3[%c0_26, %c0_27] : memref<8x16xf32, #tpu.memory_space<vmem>>, vector<8x16xf32>
    tpu.vector_store %arg3[%c0_26, %c0_27], %59 {strides = array<i32>} : memref<8x16xf32, #tpu.memory_space<vmem>>, vector<8x16xf32>,
    return
  }
}

</mosaic_0001>

<bundles_post_ra>
// kernel: vae_forward.1
= control target key start
LH: loop header
LB: loop body
LE: loop exit
PB: predicated region body
PF: predicated region fallthrough
CT: control target
= control target key end

     0   :  { %10 = vsyncpa [#allocation3], 0  ;;  %s935_s0 = inlined_call_operand.vmem [shape: f32[8,16], index: 0, kind: input, shape index: {}]   ;;  %s936_s1 = inlined_call_operand.vmem [shape: f32[8,4], index: 1, kind: input, shape index: {}]   ;;  %s937_s2 = inlined_call_operand.hbm [shape: f32[192,128], index: 2, kind: input, shape index: {}]   ;;  %s938_s3 = inlined_call_operand.hbm [shape: f32[8,16], index: 3, kind: output, shape index: {0}]   ;;  %s939_s4 = inlined_call_operand.hbm [shape: f32[1,1], index: 4, kind: output, shape index: {1}]  }
   0x1   :  { %11 = vsyncpa [#allocation4], 0 }
   0x2   :  { %12 = vsyncpa [#allocation5], 0  ;;  %s826_s15 = smov [#allocation2]  }
   0x3   :  { %s22_s16 = sshll.u32 %s826_s15, 4  ;;  %s23_s16 = int_to_ptr.vmem [resolvable:$true] %s22_s16 }
   0x4   :  { %s780_s17 = scalar_lea.vmem %s23_s16, 3072  ;;  %p785_p1 = scmp.lt.s32.totalorder %s23_s16, %s23_s16 }
   0x5   :  { %p781_p0 = scmp.ne.s32.totalorder %s23_s16, %s780_s17  ;;  %p786_p2 = scmp.lt.s32.totalorder %s780_s17, %s780_s17 }
   0x7   :  { %p787_p3 = por %p786_p2, %p785_p1 }
   0x9   :  { %p788_p4 = pnand %p787_p3, %p781_p0 }
   0xb   :  { %791 = shalt.err (!%p788_p4)
}
   0xc   :  { %s827_s18 = smov 128   ;;  %s828_s19 = smov 8  }
   0xd   :  { %28 = dma.hbm_to_vmem [thread:$0]  %s937_s2, 3072, %s23_s16, [#allocation3], %s827_s18, %s827_s18, %s828_s19  }
   0xe   :  { %820 = dma.done.wait [#allocation3], 3072  }
   0xf   :  { %821 = vsyncadd [#allocation3], 4294964224  ;;  %v829_v0 = vmov 0.0   ;;  %vm830_vm0 = vmmov 0   ;;  %v35_v1 = vld [vmem:[#allocation2 + $0x8] sm:$0xff]  ;;  %v34_v2 = vld [vmem:[#allocation2] sm:$0xff]  ;;  %v36_v9 = vlaneseq }
  0x10   :  { %694 = vmatprep.subr.mxu0 %v829_v0  ;;  %698 = vmatprep.mubr.msk.f32.mxu0 %vm830_vm0, %v829_v0  ;;  %v33_v3 = vld [vmem:[%s935_s0] sm:$0xff]  ;;  %vm40_vm1 = vcmask 130048   ;;  %v118_v4 = vld [vmem:[#allocation2 + $0x28] sm:$0xff]  ;;  %v116_v6 = vld [vmem:[#allocation2 + $0x18] sm:$0xff]  ;;  %vm123_vm2 = vcmask 261120   ;;  %vm388_vm3 = vcmask 1043456  }
  0x11   :  { %701 = vmatprep.subr.mxu1 %v829_v0  ;;  %709 = vmatprep.mubr.msk.f32.mxu1 %vm830_vm0, %v829_v0  ;;  %v117_v5 = vld [vmem:[#allocation2 + $0x20] sm:$0xff]  ;;  %v115_v7 = vld [vmem:[#allocation2 + $0x10] sm:$0xff]  ;;  %v201_v8 = vld [vmem:[#allocation2 + $0x48] sm:$0xff]  ;;  %v880_v10 = vshrl.u32 %v36_v9, 7  ;;  %vm367_vm4 = vcmask 31744   ;;  %s831_s24 = smov [#allocation7]  }
  0x12   :  { %695 = vmatpush3.msra.mxu0 %v35_v1  ;;  %702 = vmatpush3.msra.mxu1 %v118_v4  ;;  %v883_v12 = vld [vmem:[#allocation2 + $0xb8] sm:$0xff]  ;;  %v282_v18 = vld [vmem:[#allocation2 + $0x68] sm:$0xff]  ;;  %v200_v19 = vld [vmem:[#allocation2 + $0x40] sm:$0xff]  ;;  %s832_s27 = smov [#allocation6]  }
  0x13   :  { %696 = vmatprep.subr.mxu0 %v829_v0  ;;  %703 = vmatprep.subr.mxu1 %v829_v0  ;;  %v38_v11 = vsub.s32 0, %v880_v10  ;;  %v281_v20 = vld [vmem:[#allocation2 + $0x60] sm:$0xff]  ;;  %v199_v21 = vld [vmem:[#allocation2 + $0x38] sm:$0xff]  ;;  %v198_v23 = vld [vmem:[#allocation2 + $0x30] sm:$0xff]  ;;  %v121_v25 = vsub.s32 1, %v880_v10  ;;  %v285_v32 = vsub.s32 3, %v880_v10 }
  0x14   :  { %697 = vmatpush3.msra.mxu0 %v34_v2  ;;  %704 = vmatpush3.msra.mxu1 %v117_v5  ;;  %v280_v22 = vld [vmem:[#allocation2 + $0x58] sm:$0xff]  ;;  %v279_v24 = vld [vmem:[#allocation2 + $0x50] sm:$0xff]  ;;  %v204_v40 = vsub.s32 2, %v880_v10  ;;  %v359_v43 = vld [vmem:[%s936_s1] sm:$0xff]  ;;  %v383_v2 = vsub.s32 4, %v880_v10  ;;  %s633_s28 = sshll.u32 %s832_s27, 4  ;;  %s634_s28 = int_to_ptr.vmem [resolvable:$true] %s633_s28 }
  0x15   :  { %699 = vmatmul.mubr.msk.f32.vlgmr.msra.gmra.mxu0 %vm40_vm1, %v33_v3  ;;  %712 = vmatprep.subr.mxu0 %v829_v0  ;;  %v39_v13 = vrot.slane %v883_v12, %v38_v11  ;;  %v122_v26 = vrot.slane %v883_v12, %v121_v25  ;;  %v380_v31 = vld [vmem:[#allocation2 + $0x70] sm:$0xf]  ;;  %v286_v33 = vrot.slane %v883_v12, %v285_v32  ;;  %v465_v54 = vld [vmem:[#allocation2 + $0x88] sm:$0xff]  ;;  %v464_v55 = vld [vmem:[#allocation2 + $0x80] sm:$0xff]  ;;  %s800_s29 = scalar_lea.vmem %s634_s28, 128  ;;  %p805_p6 = scmp.lt.s32.totalorder %s634_s28, %s634_s28 }
  0x16   :  { %720 = vmatprep.mubr.msk.f32.mxu0 %vm830_vm0, %v829_v0  ;;  %705 = vmatprep.subr.mxu1 %v829_v0  ;;  %v205_v41 = vrot.slane %v883_v12, %v204_v40  ;;  %v466_v53 = vld [vmem:[#allocation2 + $0x90] sm:$0xff]  ;;  %v463_v56 = vld [vmem:[#allocation2 + $0x78] sm:$0xff]  ;;  %v384_v3 = vrot.slane %v883_v12, %v383_v2  ;;  %v546_v9 = vld [vmem:[#allocation2 + $0xa0] sm:$0xff]  ;;  %p801_p5 = scmp.ne.s32.totalorder %s634_s28, %s800_s29  ;;  %p806_p7 = scmp.lt.s32.totalorder %s800_s29, %s800_s29 }
  0x17   :  { %706 = vmatpush3.msra.mxu1 %v116_v6  ;;  %713 = vmatpush3.msra.mxu0 %v201_v8  ;;  %v548_v57 = vld [vmem:[#allocation2 + $0xb0] sm:$0xff]  ;;  %v547_v8 = vld [vmem:[#allocation2 + $0xa8] sm:$0xff]  ;;  %v545_v11 = vld [vmem:[#allocation2 + $0x98] sm:$0xff] }
  0x18   :  { %707 = vmatprep.subr.mxu1 %v829_v0  ;;  %714 = vmatprep.subr.mxu0 %v829_v0  ;;  %p807_p8 = por %p806_p7, %p805_p6 }
  0x19   :  { %708 = vmatpush3.msra.mxu1 %v115_v7  ;;  %715 = vmatpush3.msra.mxu0 %v200_v19  ;;  %v551_v19 = vsub.s32 6, %v880_v10 }
  0x1a   :  { %723 = vmatprep.subr.mxu1 %v829_v0  ;;  %716 = vmatprep.subr.mxu0 %v829_v0  ;;  %p808_p9 = pnand %p807_p8, %p801_p5 }
  0x1b   :  { %717 = vmatpush3.msra.mxu0 %v199_v21 }
  0x1c   :  { %718 = vmatprep.subr.mxu0 %v829_v0 }
  0x1d   :  { %719 = vmatpush3.msra.mxu0 %v198_v23 }
  0x1e   :  { %734 = vmatprep.subr.mxu0 %v829_v0 }
  0xd5   :  { %v110_v14 = vpop.f32.mrf.mxu0 }
  0xd6   :  { %v111_v15 = vadd.f32 %v110_v14, %v39_v13  ;;  %v469_v13 = vsub.s32 5, %v880_v10 }
  0xd7   :  { %v700_v16 = vpop.f32.mrf.mxu0 }
  0xd8   :  { %v114_v17 = vmax.f32 %v111_v15, 0.0  ;;  %v470_v14 = vrot.slane %v883_v12, %v469_v13 }
  0xda   :  { %710 = vmatmul.mubr.msk.f32.vlgmr.msra.gmra.mxu1 %vm123_vm2, %v114_v17 }
  0xdb   :  { %724 = vmatpush3.msra.mxu1 %v282_v18  ;;  %731 = vmatprep.mubr.msk.f32.mxu1 %vm830_vm0, %v829_v0 }
  0xdc   :  { %725 = vmatprep.subr.mxu1 %v829_v0 }
  0xdd   :  { %726 = vmatpush3.msra.mxu1 %v281_v20 }
  0xde   :  { %727 = vmatprep.subr.mxu1 %v829_v0 }
  0xdf   :  { %728 = vmatpush3.msra.mxu1 %v280_v22 }
  0xe0   :  { %729 = vmatprep.subr.mxu1 %v829_v0 }
  0xe1   :  { %730 = vmatpush3.msra.mxu1 %v279_v24 }
  0xe2   :  { %750 = vmatprep.subr.mxu1 %v829_v0 }
 0x19a   :  { %v193_v27 = vpop.f32.mrf.mxu1 }
 0x19b   :  { %v194_v28 = vadd.f32 %v193_v27, %v122_v26 }
 0x19c   :  { %v711_v29 = vpop.f32.mrf.mxu1 }
 0x19d   :  { %v197_v30 = vmax.f32 %v194_v28, 0.0 }
 0x19f   :  { %721 = vmatmul.mubr.msk.f32.vlgmr.msra.gmra.mxu0 %vm123_vm2, %v197_v30  ;;  %732 = vmatmul.mubr.msk.f32.vlgmr.msra.gmra.mxu1 %vm123_vm2, %v197_v30 }
 0x1a0   :  { %736 = vmatprep.mubr.msk.f32.mxu0 %vm830_vm0, %v829_v0  ;;  %758 = vmatprep.mubr.msk.f32.mxu1 %vm830_vm0, %v829_v0 }
 0x1a1   :  { %735 = vmatpush3.msk.msra.mxu0 %vm388_vm3, %v380_v31  ;;  %751 = vmatpush3.msra.mxu1 %v548_v57 }
 0x1a2   :  { %739 = vmatprep.subr.mxu0 %v829_v0  ;;  %752 = vmatprep.subr.mxu1 %v829_v0 }
 0x1a3   :  { %753 = vmatpush3.msra.mxu1 %v547_v8 }
 0x1a4   :  { %754 = vmatprep.subr.mxu1 %v829_v0 }
 0x1a5   :  { %755 = vmatpush3.msra.mxu1 %v546_v9 }
 0x1a6   :  { %756 = vmatprep.subr.mxu1 %v829_v0 }
 0x1a7   :  { %757 = vmatpush3.msra.mxu1 %v545_v11 }
 0x25f   :  { %v275_v34 = vpop.f32.mrf.mxu0  ;;  %v353_v35 = vpop.f32.mrf.mxu1 }
 0x260   :  { %v354_v36 = vadd.f32 %v353_v35, %v286_v33  ;;  %v276_v42 = vadd.f32 %v275_v34, %v205_v41 }
 0x261   :  { %v722_v37 = vpop.f32.mrf.mxu0  ;;  %v733_v38 = vpop.f32.mrf.mxu1 }
 0x262   :  { %v357_v39 = vmul.f32 1.442695, %v354_v36  ;;  %v363_v45 = vmul.f32 %v276_v42, %v276_v42 }
 0x264   :  { %770 = vpow2.f32 %v357_v39 }
 0x271   :  { %v771_v44 = vpop.eup %770 }
 0x272   :  { %v360_v46 = vmul.f32 %v771_v44, %v359_v43  ;;  %v362_v47 = vmul.f32 %v771_v44, %v771_v44 }
 0x274   :  { %v361_v48 = vadd.f32 %v360_v46, %v276_v42  ;;  %v364_v49 = vadd.f32 %v363_v45, %v362_v47 }
 0x276   :  { %737 = vmatmul.mubr.msk.f32.vlgmr.msra.gmra.mxu0 %vm367_vm4, %v361_v48  ;;  %v365_v50 = vsub.f32 %v364_v49, %v354_v36 }
 0x277   :  { %747 = vmatprep.mubr.msk.f32.mxu0 %vm830_vm0, %v829_v0  ;;  %740 = vmatpush3.msra.mxu0 %v466_v53 }
 0x278   :  { %v659_v51 = vadd.f32 -0.5, %v365_v50  ;;  %741 = vmatprep.subr.mxu0 %v829_v0 }
 0x279   :  { %742 = vmatpush3.msra.mxu0 %v465_v54 }
 0x27a   :  { %v368_v52 = vsel %vm367_vm4, %v659_v51, 0.0  ;;  %743 = vmatprep.subr.mxu0 %v829_v0 }
 0x27b   :  { %369 = vadd.xlane.f32.xlu0 %v368_v52  ;;  %744 = vmatpush3.msra.mxu0 %v464_v55 }
 0x27c   :  { %745 = vmatprep.subr.mxu0 %v829_v0  ;;  %v552_v0 = vrot.slane %v883_v12, %v551_v19 }
 0x27d   :  { %746 = vmatpush3.msra.mxu0 %v463_v56 }
 0x304   :  { %v370_v58 = vpop.xlane.xlu0 %369 }
 0x305   :  { %v371_v59 = vrot.slane %v370_v58, 4 }
 0x307   :  { %v372_v60 = vadd.f32 %v371_v59, %v370_v58 }
 0x309   :  { %v373_v61 = vrot.slane %v372_v60, 2 }
 0x30b   :  { %v374_v62 = vadd.f32 %v373_v61, %v372_v60 }
 0x30d   :  { %v375_v63 = vrot.slane %v374_v62, 1 }
 0x30f   :  { %v376_v1 = vadd.f32 %v375_v63, %v374_v62 }
 0x311   :  { %761 = vpush %v376_v1 }
 0x336   :  { %v458_v4 = vpop.f32.mrf.mxu0 }
 0x337   :  { %v459_v5 = vadd.f32 %v458_v4, %v384_v3 }
 0x338   :  { %v738_v6 = vpop.f32.mrf.mxu0 }
 0x339   :  { %v462_v7 = vmax.f32 %v459_v5, 0.0 }
 0x33b   :  { %748 = vmatmul.mubr.msk.f32.vlgmr.msra.gmra.mxu0 %vm123_vm2, %v462_v7 }
 0x342   :  { %s762_s1 = spop %761 }
 0x343   :  { %379 = sst [smem:[#allocation7]] %s762_s1 }
 0x344   :  { %644 = dma.smem_to_hbm %s831_s24, 16, %s939_s4, [#allocation5]  }
 0x3fb   :  { %v540_v15 = vpop.f32.mrf.mxu0 }
 0x3fc   :  { %v541_v16 = vadd.f32 %v540_v15, %v470_v14 }
 0x3fd   :  { %v749_v17 = vpop.f32.mrf.mxu0 }
 0x3fe   :  { %v544_v18 = vmax.f32 %v541_v16, 0.0 }
 0x400   :  { %759 = vmatmul.mubr.msk.f32.vlgmr.msra.gmra.mxu1 %vm123_vm2, %v544_v18 }
 0x4c0   :  { %v622_v20 = vpop.f32.mrf.mxu1 }
 0x4c1   :  { %v623_v21 = vadd.f32 %v622_v20, %v552_v0 }
 0x4c2   :  { %v760_v22 = vpop.f32.mrf.mxu1 }
 0x4c3   :  { %626 = vst.msk [vmem:[#allocation6] sm:$0xff] %vm40_vm1, %v623_v21 }
 0x4c4   :  { %811 = shalt.err (!%p808_p9)
}
 0x4c5   :  { %636 = dma.vmem_to_hbm [thread:$0]  %s634_s28, 128, %s938_s3, [#allocation4]  }
 0x4c6   :  { %822 = dma.done.wait [#allocation4], 128  }
 0x4c7   :  { %823 = vsyncadd [#allocation4], 4294967168 }
 0x4c8   :  { %824 = dma.done.wait [#allocation5], 16  }
 0x4c9   :  { %825 = vsyncadd [#allocation5], 4294967280 }
 0x4ca   :  { %651 = sfence }
 0x4cb   :  { %652 = vsyncpa [#allocation3], 1 }
 0x4cc   :  { %653 = vsyncpa [#allocation4], 1 }
 0x4cd   :  { %654 = vsyncpa [#allocation5], 1 }

</bundles_post_ra>
